<compile_context>
chip_gen: v7x
topology: tpu7x:2x2x1
jax: 0.10.0
libtpu: 0.0.40
codegen_flags: <defaults>
</compile_context>

<pallas_src>
import jax
import jax.numpy as jnp
from jax.experimental import pallas as pl
from jax.experimental.pallas import tpu as pltpu

C1 = 16                  # conv1_number_of_channels
C2 = 32                  # conv2_number_of_channels
EPS = 1e-12              # torch.nn.functional.normalize eps
PACK = 4                 # samples packed per sublane row (block-diag weights)
DEFAULT_TILE_ROWS = 2048  # packed rows per grid step (= 8192 samples at PACK=4)


def _fused_kernel(x_ref, a1_ref, a2_ref, a3_ref, g_ref, out_ref):
    # matmul 1: conv1 (+bias via the ones column) + ReLU           (rows, P*65)
    flat1 = jnp.maximum(
        jnp.dot(x_ref[...], a1_ref[...], preferred_element_type=jnp.float32), 0.0)

    # matmul 2: fused [conv2 | pred1-linear | ones passthrough] + ReLU  (rows, P*36)
    h = jnp.maximum(
        jnp.dot(flat1.astype(jnp.bfloat16), a2_ref[...],
                preferred_element_type=jnp.float32), 0.0)

    # matmul 3: [pred1 passthrough | pred2 head | zero pad] -> packed heads (rows, P*8)
    g = jnp.dot(h.astype(jnp.bfloat16), a3_ref[...],
                preferred_element_type=jnp.float32)
    clipped = jnp.clip(g, 0.0, 1.0)

    # per-sample / per-head L1 sums via a tiny 0/1 f32 matmul (exact), then normalize.
    s = jnp.dot(clipped, g_ref[...], preferred_element_type=jnp.float32)
    out_ref[...] = clipped * pl.reciprocal(jnp.maximum(s, EPS), approx=False)


def init_params(key, c1=C1, c2=C2):
    ks = jax.random.split(key, 8)
    # torch shapes: conv1 (C1,2,1,2,2), conv2 (C2,C1,1,2,2) -- depth dim (=1) dropped.
    W1 = 0.3 * jax.random.normal(ks[0], (c1, 2, 2, 2), jnp.float32)
    b1 = 0.1 * jax.random.normal(ks[1], (c1,), jnp.float32)
    W2 = 0.3 * jax.random.normal(ks[2], (c2, c1, 2, 2), jnp.float32)
    b2 = 0.1 * jax.random.normal(ks[3], (c2,), jnp.float32)
    Wp1 = 0.3 * jax.random.normal(ks[4], (3, c1 * 4), jnp.float32)  # pred1: (c1,h,w) flatten order
    bp1 = 0.1 * jax.random.normal(ks[5], (3,), jnp.float32)
    Wp2 = 0.3 * jax.random.normal(ks[6], (3, c2), jnp.float32)      # pred2 linear
    bp2 = 0.1 * jax.random.normal(ks[7], (3,), jnp.float32)
    return W1, b1, W2, b2, Wp1, bp1, Wp2, bp2


def _round_up(n, m):
    return ((n + m - 1) // m) * m


def _pack_params(params, pack):
    """One-time glue: fold conv windows / biases / head packing into 4 resident arrays."""
    W1, b1, W2, b2, Wp1, bp1, Wp2, bp2 = params
    c1, c2 = W1.shape[0], W2.shape[0]
    k1 = 4 * c1

    # conv1 as an (18, 4*c1) matrix on the flattened (2,3,3) board.
    # Column order matches torch's flatten order (c1, oh, ow): col = c*4 + oh*2 + ow.
    W1f = W1.reshape(c1, 8)                                  # taps ordered (ic, kh, kw)
    Wbig = jnp.zeros((18, k1), jnp.float32)
    for p in range(4):
        oh, ow = p // 2, p % 2
        rows = jnp.array([ic * 9 + (oh + kh) * 3 + (ow + kw)
                          for ic in range(2) for kh in range(2) for kw in range(2)],
                         dtype=jnp.int32)
        cols = jnp.arange(c1) * 4 + p
        Wbig = Wbig.at[rows[:, None], cols[None, :]].set(W1f.T)

    # A1s: acts on [board(18) | 1]; last column re-emits the 1 for later bias rows.
    A1s = jnp.zeros((19, k1 + 1), jnp.float32)
    A1s = A1s.at[:18, :k1].set(Wbig)
    A1s = A1s.at[18, :k1].set(jnp.repeat(b1, 4))             # bias row (hit by the 1)
    A1s = A1s.at[18, k1].set(1.0)                            # ones passthrough

    # A2s: fused [conv2 | pred1 linear | ones passthrough] on flat1 ((c1,h,w) order).
    A2s = jnp.zeros((k1 + 1, c2 + 4), jnp.float32)
    A2s = A2s.at[:k1, :c2].set(W2.reshape(c2, k1).T)
    A2s = A2s.at[:k1, c2:c2 + 3].set(Wp1.T)
    A2s = A2s.at[k1, :c2].set(b2)
    A2s = A2s.at[k1, c2:c2 + 3].set(bp1)
    A2s = A2s.at[k1, c2 + 3].set(1.0)

    # A3s: columns [pred1 passthrough (3) | pred2 head (3) | zero pad (2)].
    A3s = jnp.zeros((c2 + 4, 8), jnp.float32)
    A3s = A3s.at[c2:c2 + 3, 0:3].set(jnp.eye(3, dtype=jnp.float32))
    A3s = A3s.at[:c2, 3:6].set(Wp2.T)
    A3s = A3s.at[c2 + 3, 3:6].set(bp2)                       # bias row via the 1 lane

    # Per-sample L1 group-sum matrix (two heads of 3 inside each 8-lane slot).
    g8 = jnp.zeros((8, 8), jnp.float32)
    g8 = g8.at[0:3, 0:3].set(1.0).at[3:6, 3:6].set(1.0)

    # Block-diagonal replication for the lane-packed batch (PACK samples per row).
    eye_p = jnp.eye(pack, dtype=jnp.float32)
    A1 = jnp.kron(eye_p, A1s).astype(jnp.bfloat16)           # (P*19, P*(4c1+1))
    A2 = jnp.kron(eye_p, A2s).astype(jnp.bfloat16)           # (P*(4c1+1), P*(c2+4))
    A3 = jnp.kron(eye_p, A3s).astype(jnp.bfloat16)           # (P*(c2+4), P*8)
    G = jnp.kron(eye_p, g8)                                  # f32 (exact 0/1 sums)
    return A1, A2, A3, G


def _choose_tile(n_pack, tile_rows):
    """Packed-row tile: multiple of 8, and >=2 grid steps when there is enough work
    so v7x's two TensorCores both get a share (no-op on single-TC v5e/v6e)."""
    full = _round_up(max(n_pack, 1), 8)
    if full > tile_rows:
        return tile_rows
    if full >= 16:
        return _round_up(full // 2, 8)
    return full


def conv_predictor_direct_forward(x, params, tile_rows=DEFAULT_TILE_ROWS, pack=PACK):
    """x: (N, 2, 1, 3, 3) float32 (NCDHW).  Returns (regression1, regression2), each (N, 3)."""
    assert x.shape[1:] == (2, 1, 3, 3), "ConvPredictorDirect expects a (2,1,3,3) board"
    N = x.shape[0]
    A1, A2, A3, G = _pack_params(params, pack)

    # Flatten the board, append the bias/ones lane, cast matmul operand to bf16.
    xf = x.reshape(N, 18).astype(jnp.float32)
    xf = jnp.concatenate([xf, jnp.ones((N, 1), jnp.float32)], axis=1)    # (N, 19)
    xf = xf.astype(jnp.bfloat16)

    # Lane-pack `pack` samples per row (free row-major reshape) and pad the batch.
    n_pack = (N + pack - 1) // pack
    tr = _choose_tile(n_pack, tile_rows)
    n_rows = _round_up(n_pack, tr)
    pad_samples = n_rows * pack - N
    if pad_samples:
        xf = jnp.pad(xf, ((0, pad_samples), (0, 0)))   # padded rows -> zeros -> sliced off
    xp = xf.reshape(n_rows, pack * 19)

    grid = (n_rows // tr,)
    out = pl.pallas_call(
        _fused_kernel,
        out_shape=jax.ShapeDtypeStruct((n_rows, pack * 8), jnp.float32),
        grid=grid,
        in_specs=[
            pl.BlockSpec((tr, pack * 19), lambda i: (i, 0)),   # packed boards (pipelined)
            pl.BlockSpec(A1.shape, lambda i: (0, 0)),          # conv1  [W;b|1]   (resident)
            pl.BlockSpec(A2.shape, lambda i: (0, 0)),          # conv2|pred1|1    (resident)
            pl.BlockSpec(A3.shape, lambda i: (0, 0)),          # heads packer     (resident)
            pl.BlockSpec(G.shape, lambda i: (0, 0)),           # L1 group sums    (resident)
        ],
        out_specs=pl.BlockSpec((tr, pack * 8), lambda i: (i, 0)),   # lane-dense packed heads
        compiler_params=pltpu.CompilerParams(
            dimension_semantics=("parallel",),            # shard batch across v7x's 2 TCs
            vmem_limit_bytes=48 * 1024 * 1024),           # < v7x 64 MiB physical; fine on v5e/v6e
    )(xp, A1, A2, A3, G)

    out = out.reshape(n_rows * pack, 8)                   # free row-major un-pack
    return out[:N, 0:3], out[:N, 3:6]


def reference_forward(x, params):
    """Pure-JAX reference matching PyTorch semantics (eval mode), f32 throughout."""
    W1, b1, W2, b2, Wp1, bp1, Wp2, bp2 = params
    N = x.shape[0]
    rows = []
    for oh in range(2):
        cols = []
        for ow in range(2):
            patch = x[:, :, 0, oh:oh + 2, ow:ow + 2]              # (N,2,2,2)
            cols.append(jnp.einsum('nckl,ockl->no', patch, W1) + b1)
        rows.append(jnp.stack(cols, axis=-1))                     # (N,C1,2)
    act1 = jnp.maximum(jnp.stack(rows, axis=-2), 0.0)             # (N,C1,2,2)
    act2 = jnp.maximum(jnp.einsum('nchw,ochw->no', act1, W2) + b2, 0.0)
    flat1 = act1.reshape(N, -1)                                   # (c1,h,w) order
    r1 = jnp.clip(flat1 @ Wp1.T + bp1, 0.0, 1.0)
    r1 = r1 / jnp.maximum(jnp.sum(jnp.abs(r1), axis=1, keepdims=True), EPS)
    r2 = jnp.clip(act2 @ Wp2.T + bp2, 0.0, 1.0)
    r2 = r2 / jnp.maximum(jnp.sum(jnp.abs(r2), axis=1, keepdims=True), EPS)
    return r1, r2


if __name__ == "__main__":
    key = jax.random.PRNGKey(0)
    k_param, k_x = jax.random.split(key)
    params = init_params(k_param)

    # N=2: tiny batch; N=13: ragged PACK padding; N=40: multi-step grid + tail padding.
    for N in (2, 13, 40):
        kx = jax.random.fold_in(k_x, N)
        x = jax.random.uniform(kx, (N, 2, 1, 3, 3), jnp.float32)  # tic-tac-toe board tensor

        r1, r2 = jax.block_until_ready(conv_predictor_direct_forward(x, params))
        ref1, ref2 = reference_forward(x, params)

        assert r1.shape == (N, 3) and r2.shape == (N, 3)
        # Tolerance covers bf16 MXU operands (f32 accumulation) through three chained
        # matmuls (~<=1e-2 worst case here); layout/packing bugs would be O(0.1).
        err1 = float(jnp.max(jnp.abs(r1 - ref1)))
        err2 = float(jnp.max(jnp.abs(r2 - ref2)))
        assert err1 < 2e-2, f"regression1 mismatch (N={N}, max|err|={err1})"
        assert err2 < 2e-2, f"regression2 mismatch (N={N}, max|err|={err2})"

    print("KERNEL_OK")
</pallas_src>

<mosaic_0001>
module attributes {stable_mosaic.version = 11 : i64} {
  func.func @_fused_kernel(%arg0: i32, %arg1: memref<8x76xbf16, #tpu.memory_space<vmem>>, %arg2: memref<76x260xbf16, #tpu.memory_space<vmem>>, %arg3: memref<260x144xbf16, #tpu.memory_space<vmem>>, %arg4: memref<144x32xbf16, #tpu.memory_space<vmem>>, %arg5: memref<32x32xf32, #tpu.memory_space<vmem>>, %arg6: memref<8x32xf32, #tpu.memory_space<vmem>>) attributes {dimension_semantics = [#tpu.dimension_semantics<parallel>], iteration_bounds = array<i64: 1>, scalar_prefetch = 0 : i64, scratch_operands = 0 : i64, tpu.core_type = #tpu.core_type<tc>, window_params = [{transform_indices = @transform_0, window_bounds = array<i64: 8, 76>}, {pipeline_mode = #tpu.pipeline_mode<synchronous>, transform_indices = @transform_1, window_bounds = array<i64: 76, 260>}, {pipeline_mode = #tpu.pipeline_mode<synchronous>, transform_indices = @transform_2, window_bounds = array<i64: 260, 144>}, {pipeline_mode = #tpu.pipeline_mode<synchronous>, transform_indices = @transform_3, window_bounds = array<i64: 144, 32>}, {pipeline_mode = #tpu.pipeline_mode<synchronous>, transform_indices = @transform_4, window_bounds = array<i64: 32, 32>}, {transform_indices = @transform_5, window_bounds = array<i64: 8, 32>}]} {
    %c0 = arith.constant 0 : index
    %c0_0 = arith.constant 0 : index
    %0 = vector.load %arg1[%c0, %c0_0] : memref<8x76xbf16, #tpu.memory_space<vmem>>, vector<8x76xbf16>
    %c0_1 = arith.constant 0 : index
    %c0_2 = arith.constant 0 : index
    %1 = vector.load %arg2[%c0_1, %c0_2] : memref<76x260xbf16, #tpu.memory_space<vmem>>, vector<76x260xbf16>
    %cst = arith.constant dense<0.000000e+00> : vector<8x260xf32>
    %2 = tpu.matmul %0, %1, %cst {dimension_numbers = #tpu.dot_dimension_numbers<[1], [0], [0], [1], [0, 0, 1, 1], [], []>} : vector<8x76xbf16>, vector<76x260xbf16>, vector<8x260xf32> -> vector<8x260xf32>
    %cst_3 = arith.constant 0.000000e+00 : f32
    %3 = vector.broadcast %cst_3 : f32 to vector<8x260xf32>
    %4 = arith.maximumf %2, %3 : vector<8x260xf32>
    %5 = arith.truncf %4 : vector<8x260xf32> to vector<8x260xbf16>
    %c0_4 = arith.constant 0 : index
    %c0_5 = arith.constant 0 : index
    %6 = vector.load %arg3[%c0_4, %c0_5] : memref<260x144xbf16, #tpu.memory_space<vmem>>, vector<260x144xbf16>
    %cst_6 = arith.constant dense<0.000000e+00> : vector<8x144xf32>
    %7 = tpu.matmul %5, %6, %cst_6 {dimension_numbers = #tpu.dot_dimension_numbers<[1], [0], [0], [1], [0, 0, 1, 1], [], []>} : vector<8x260xbf16>, vector<260x144xbf16>, vector<8x144xf32> -> vector<8x144xf32>
    %cst_7 = arith.constant 0.000000e+00 : f32
    %8 = vector.broadcast %cst_7 : f32 to vector<8x144xf32>
    %9 = arith.maximumf %7, %8 : vector<8x144xf32>
    %10 = arith.truncf %9 : vector<8x144xf32> to vector<8x144xbf16>
    %c0_8 = arith.constant 0 : index
    %c0_9 = arith.constant 0 : index
    %11 = vector.load %arg4[%c0_8, %c0_9] : memref<144x32xbf16, #tpu.memory_space<vmem>>, vector<144x32xbf16>
    %cst_10 = arith.constant dense<0.000000e+00> : vector<8x32xf32>
    %12 = tpu.matmul %10, %11, %cst_10 {dimension_numbers = #tpu.dot_dimension_numbers<[1], [0], [0], [1], [0, 0, 1, 1], [], []>} : vector<8x144xbf16>, vector<144x32xbf16>, vector<8x32xf32> -> vector<8x32xf32>
    %cst_11 = arith.constant 0.000000e+00 : f32
    %cst_12 = arith.constant 1.000000e+00 : f32
    %13 = vector.broadcast %cst_11 : f32 to vector<8x32xf32>
    %14 = arith.maximumf %13, %12 : vector<8x32xf32>
    %15 = vector.broadcast %cst_12 : f32 to vector<8x32xf32>
    %16 = arith.minimumf %15, %14 : vector<8x32xf32>
    %c0_13 = arith.constant 0 : index
    %c0_14 = arith.constant 0 : index
    %17 = vector.load %arg5[%c0_13, %c0_14] : memref<32x32xf32, #tpu.memory_space<vmem>>, vector<32x32xf32>
    %cst_15 = arith.constant dense<0.000000e+00> : vector<8x32xf32>
    %18 = tpu.matmul %16, %17, %cst_15 {dimension_numbers = #tpu.dot_dimension_numbers<[1], [0], [0], [1], [0, 0, 1, 1], [], []>} : vector<8x32xf32>, vector<32x32xf32>, vector<8x32xf32> -> vector<8x32xf32>
    %cst_16 = arith.constant 9.99999996E-13 : f32
    %19 = vector.broadcast %cst_16 : f32 to vector<8x32xf32>
    %20 = arith.maximumf %18, %19 : vector<8x32xf32>
    %21 = tpu.reciprocal %20 : vector<8x32xf32> -> vector<8x32xf32>
    %22 = arith.mulf %16, %21 : vector<8x32xf32>
    %c0_17 = arith.constant 0 : index
    %c0_18 = arith.constant 0 : index
    %23 = vector.load %arg6[%c0_17, %c0_18] : memref<8x32xf32, #tpu.memory_space<vmem>>, vector<8x32xf32>
    tpu.vector_store %arg6[%c0_17, %c0_18], %22 {strides = array<i32>} : memref<8x32xf32, #tpu.memory_space<vmem>>, vector<8x32xf32>,
    return
  }
  func.func @transform_0(%arg0: i32) -> (i32, i32) {
    %c0_i32 = arith.constant 0 : i32
    %c0_i32_0 = arith.constant 0 : i32
    return %arg0, %c0_i32 : i32, i32
  }
  func.func @transform_1(%arg0: i32) -> (i32, i32) {
    %c0_i32 = arith.constant 0 : i32
    %c0_i32_0 = arith.constant 0 : i32
    %c0_i32_1 = arith.constant 0 : i32
    return %c0_i32, %c0_i32_0 : i32, i32
  }
  func.func @transform_2(%arg0: i32) -> (i32, i32) {
    %c0_i32 = arith.constant 0 : i32
    %c0_i32_0 = arith.constant 0 : i32
    %c0_i32_1 = arith.constant 0 : i32
    return %c0_i32, %c0_i32_0 : i32, i32
  }
  func.func @transform_3(%arg0: i32) -> (i32, i32) {
    %c0_i32 = arith.constant 0 : i32
    %c0_i32_0 = arith.constant 0 : i32
    %c0_i32_1 = arith.constant 0 : i32
    return %c0_i32, %c0_i32_0 : i32, i32
  }
  func.func @transform_4(%arg0: i32) -> (i32, i32) {
    %c0_i32 = arith.constant 0 : i32
    %c0_i32_0 = arith.constant 0 : i32
    %c0_i32_1 = arith.constant 0 : i32
    return %c0_i32, %c0_i32_0 : i32, i32
  }
  func.func @transform_5(%arg0: i32) -> (i32, i32) {
    %c0_i32 = arith.constant 0 : i32
    %c0_i32_0 = arith.constant 0 : i32
    return %arg0, %c0_i32 : i32, i32
  }
}

</mosaic_0001>

<bundles_post_ra>
// kernel: tpu_custom_call.1
= control target key start
LH: loop header
LB: loop body
LE: loop exit
PB: predicated region body
PF: predicated region fallthrough
CT: control target
= control target key end

     0   :  { %v951_v2 = vmov 0   ;;  %vm124_vm0 = vcmask 1045504   ;;  %vm120_vm1 = vcmask 621568   ;;  %v952_v19 = vmov 0.0   ;;  %s1209_s0 = inlined_call_operand.vmem [shape: bf16[8,76], index: 0, kind: input, shape index: {}]   ;;  %s1210_s1 = inlined_call_operand.vmem [shape: bf16[76,260], index: 1, kind: input, shape index: {}]   ;;  %s1211_s2 = inlined_call_operand.vmem [shape: bf16[260,144], index: 2, kind: input, shape index: {}]   ;;  %s1212_s3 = inlined_call_operand.vmem [shape: bf16[144,32], index: 3, kind: input, shape index: {}]   ;;  %s1213_s4 = inlined_call_operand.vmem [shape: f32[32,32], index: 4, kind: input, shape index: {}]   ;;  %s1214_s5 = inlined_call_operand.hbm [shape: f32[8,32], index: 5, kind: output, shape index: {}]  }
   0x1   :  { %v846_v0 = vld [vmem:[%s1210_s1 + $0x4] ss:$12 sps:$4 sm:$0xff]   ;;  %v848_v1 = vld [vmem:[%s1210_s1] ss:$12 sps:$4 sm:$0xff]   ;;  %166 = vmatprep.mubr.bf16.mxu1 %v951_v2  ;;  %v849_v3 = vld [vmem:[%s1210_s1 + $0x1c] ss:$12 sps:$4 sm:$0xff]  }
   0x2   :  { %134 = vmatprep.subr.bf16.mxu1 %v846_v0  ;;  %v851_v4 = vld [vmem:[%s1210_s1 + $0x18] ss:$12 sps:$4 sm:$0xff]   ;;  %v852_v5 = vld [vmem:[%s1210_s1 + $0x34] ss:$12 sps:$4 sm:$0xff]   ;;  %v854_v6 = vld [vmem:[%s1210_s1 + $0x30] ss:$12 sps:$4 sm:$0xff]  }
   0x3   :  { %135 = vmatpush1.bf16.msra.mxu1 %v848_v1  ;;  %v855_v7 = vld [vmem:[%s1210_s1 + $0x4c] ss:$12 sps:$4 sm:$0xff]   ;;  %v858_v8 = vld [vmem:[%s1210_s1 + $0x64] ss:$12 sps:$4 sm:$0x3f]   ;;  %vm953_vm2 = vmmov 0  }
   0x4   :  { %136 = vmatprep.subr.bf16.mxu1 %v849_v3  ;;  %v857_v9 = vld [vmem:[%s1210_s1 + $0x48] ss:$12 sps:$4 sm:$0xff]   ;;  %v860_v10 = vld [vmem:[%s1210_s1 + $0x60] ss:$12 sps:$4 sm:$0x3f]  }
   0x5   :  { %v866_v11 = vld [vmem:[%s1211_s2 + $0x4] ss:$8 sps:$4 sm:$0xff]   ;;  %v868_v12 = vld [vmem:[%s1211_s2] ss:$8 sps:$4 sm:$0xff]   ;;  %v869_v13 = vld [vmem:[%s1211_s2 + $0x14] ss:$8 sps:$4 sm:$0xff]  }
   0x6   :  { %430 = vmatprep.subr.bf16.mxu0 %v866_v11  ;;  %v126_v14 = vsel %vm124_vm0, %v860_v10, 0  ;;  %v871_v15 = vld [vmem:[%s1211_s2 + $0x10] ss:$8 sps:$4 sm:$0xff]   ;;  %v872_v16 = vld [vmem:[%s1211_s2 + $0x24] ss:$8 sps:$4 sm:$0xff]  }
   0x7   :  { %137 = vmatpush1.bf16.msra.mxu1 %v851_v4  ;;  %431 = vmatpush1.bf16.msra.mxu0 %v868_v12  ;;  %v22_v17 = vld [vmem:[%s1209_s0] sm:$0xf]  ;;  %v861_v18 = vld [vmem:[%s1210_s1 + $0x8] ss:$12 sps:$4 sm:$0xff]   ;;  %v877_v23 = vld [vmem:[%s1211_s2 + $0x30] ss:$8 sps:$4 sm:$0xff]  }
   0x8   :  { %138 = vmatprep.subr.bf16.mxu1 %v852_v5  ;;  %432 = vmatprep.subr.bf16.mxu0 %v869_v13  ;;  %v874_v20 = vld [vmem:[%s1211_s2 + $0x20] ss:$8 sps:$4 sm:$0xff]   ;;  %v875_v21 = vld [vmem:[%s1211_s2 + $0x34] ss:$8 sps:$4 sm:$0xff]   ;;  %v878_v24 = vld [vmem:[%s1211_s2 + $0x44] ss:$8 sps:$4 sm:$0xff]  }
   0x9   :  { %v862_v22 = vld [vmem:[%s1210_s1 + $0x20] ss:$12 sps:$4 sm:$0xff]   ;;  %v863_v25 = vld [vmem:[%s1210_s1 + $0x38] ss:$12 sps:$4 sm:$0xff]   ;;  %v881_v28 = vld [vmem:[%s1211_s2 + $0x54] ss:$8 sps:$4 sm:$0xff]  }
   0xa   :  { %v865_v26 = vld [vmem:[%s1210_s1 + $0x68] ss:$12 sps:$4 sm:$0x3f]   ;;  %v864_v29 = vld [vmem:[%s1210_s1 + $0x50] ss:$12 sps:$4 sm:$0xff]  }
   0xb   :  { %139 = vmatpush1.bf16.msra.mxu1 %v854_v6  ;;  %433 = vmatpush1.bf16.msra.mxu0 %v871_v15  ;;  %v880_v27 = vld [vmem:[%s1211_s2 + $0x40] ss:$8 sps:$4 sm:$0xff]   ;;  %v883_v30 = vld [vmem:[%s1211_s2 + $0x50] ss:$8 sps:$4 sm:$0xff]   ;;  %v884_v31 = vld [vmem:[%s1211_s2 + $0x64] ss:$8 sps:$4 sm:$0xff]  }
   0xc   :  { %140 = vmatprep.subr.bf16.mxu1 %v855_v7  ;;  %434 = vmatprep.subr.bf16.mxu0 %v872_v16  ;;  %v132_v32 = vsel %vm124_vm0, %v865_v26, 0  ;;  %v886_v33 = vld [vmem:[%s1211_s2 + $0x60] ss:$8 sps:$4 sm:$0xff]   ;;  %v887_v34 = vld [vmem:[%s1211_s2 + $0x74] ss:$8 sps:$4 sm:$0xff]  }
   0xf   :  { %141 = vmatpush1.bf16.msra.mxu1 %v857_v9  ;;  %435 = vmatpush1.bf16.msra.mxu0 %v874_v20 }
  0x10   :  { %745 = vmatprep.subr.msk.bf16.mxu1 %vm124_vm0, %v858_v8  ;;  %436 = vmatprep.subr.bf16.mxu0 %v875_v21 }
  0x13   :  { %143 = vmatpush1.bf16.msra.mxu1 %v126_v14  ;;  %437 = vmatpush1.bf16.msra.mxu0 %v877_v23 }
  0x14   :  { %806 = vmatprep.subr.bf16.mxu1 %v952_v19  ;;  %438 = vmatprep.subr.bf16.mxu0 %v878_v24 }
  0x16   :  { %746 = vmatmul.mubr.msk.bf16.vlgmr.msra.gmra.mrb[0].mxu1 %vm120_vm1, %v22_v17 }
  0x17   :  { %807 = vmatpush3.bf16.msra.mxu1 %v861_v18  ;;  %816 = vmatprep.mubr.msk.bf16.mxu1 %vm953_vm2, %v952_v19 }
  0x18   :  { %808 = vmatprep.subr.bf16.mxu1 %v952_v19  ;;  %439 = vmatpush1.bf16.msra.mxu0 %v880_v27 }
  0x19   :  { %440 = vmatprep.subr.bf16.mxu0 %v881_v28 }
  0x1b   :  { %809 = vmatpush3.bf16.msra.mxu1 %v862_v22 }
  0x1c   :  { %810 = vmatprep.subr.bf16.mxu1 %v952_v19  ;;  %441 = vmatpush1.bf16.msra.mxu0 %v883_v30 }
  0x1d   :  { %442 = vmatprep.subr.bf16.mxu0 %v884_v31 }
  0x1f   :  { %811 = vmatpush3.bf16.msra.mxu1 %v863_v25 }
  0x20   :  { %812 = vmatprep.subr.bf16.mxu1 %v952_v19 }
  0x23   :  { %813 = vmatpush3.bf16.msra.mxu1 %v864_v29 }
  0x24   :  { %814 = vmatprep.subr.bf16.mxu1 %v952_v19 }
  0x25   :  { %10 = vsyncpa [#allocation3], 0  ;;  %443 = vmatpush1.bf16.msra.mxu0 %v886_v33  ;;  %v889_v35 = vld [vmem:[%s1211_s2 + $0x70] ss:$8 sps:$4 sm:$0xff]   ;;  %v890_v36 = vld [vmem:[%s1211_s2 + $0x84] ss:$8 sps:$4 sm:$0xff]  }
  0x26   :  { %444 = vmatprep.subr.bf16.mxu0 %v887_v34  ;;  %v892_v37 = vld [vmem:[%s1211_s2 + $0x80] ss:$8 sps:$4 sm:$0xff]   ;;  %v893_v38 = vld [vmem:[%s1211_s2 + $0x94] ss:$8 sps:$4 sm:$0xff]   ;;  %v895_v39 = vld [vmem:[%s1211_s2 + $0x90] ss:$8 sps:$4 sm:$0xff]  }
  0x27   :  { %815 = vmatpush3.bf16.msra.mxu1 %v132_v32  ;;  %v896_v40 = vld [vmem:[%s1211_s2 + $0xa4] ss:$8 sps:$4 sm:$0xff]   ;;  %v898_v41 = vld [vmem:[%s1211_s2 + $0xa0] ss:$8 sps:$4 sm:$0xff]   ;;  %v899_v42 = vld [vmem:[%s1211_s2 + $0xb4] ss:$8 sps:$4 sm:$0xff]  }
  0x28   :  { %592 = vmatprep.subr.bf16.mxu1 %v951_v2  ;;  %v901_v43 = vld [vmem:[%s1211_s2 + $0xb0] ss:$8 sps:$4 sm:$0xff]   ;;  %v902_v44 = vld [vmem:[%s1211_s2 + $0xc4] ss:$8 sps:$4 sm:$0xff]   ;;  %v904_v45 = vld [vmem:[%s1211_s2 + $0xc0] ss:$8 sps:$4 sm:$0xff]  }
  0x29   :  { %445 = vmatpush1.bf16.msra.mxu0 %v889_v35  ;;  %v905_v46 = vld [vmem:[%s1211_s2 + $0xd4] ss:$8 sps:$4 sm:$0xff]   ;;  %v907_v47 = vld [vmem:[%s1211_s2 + $0xd0] ss:$8 sps:$4 sm:$0xff]   ;;  %v908_v48 = vld [vmem:[%s1211_s2 + $0xe4] ss:$8 sps:$4 sm:$0xff]  }
  0x2a   :  { %817 = vmatmul.mubr.msk.bf16.vlgmr.msra.gmra.mrb[4].mxu1 %vm120_vm1, %v22_v17  ;;  %446 = vmatprep.subr.bf16.mxu0 %v890_v36  ;;  %v910_v49 = vld [vmem:[%s1211_s2 + $0xe0] ss:$8 sps:$4 sm:$0xff]   ;;  %v911_v50 = vld [vmem:[%s1211_s2 + $0xf4] ss:$8 sps:$4 sm:$0xff]   ;;  %v913_v51 = vld [vmem:[%s1211_s2 + $0xf0] ss:$8 sps:$4 sm:$0xff]  }
  0x2b   :  { %v253_v52 = vld [vmem:[%s1211_s2 + $0x100] sm:$0x33]  ;;  %vm423_vm3 = vcmask 1041408   ;;  %v917_v57 = vld [vmem:[%s1212_s3 + $0x8] sm:$0xff]   ;;  %v918_v58 = vld [vmem:[%s1212_s3 + $0x10] sm:$0xff]   ;;  %vm419_vm4 = vcmask 31744  }
  0x2c   :  { %v781_v53 = vcombine.high %v253_v52, %v253_v52  ;;  %v780_v54 = vcombine.low %v253_v52, %v253_v52  ;;  %v916_v56 = vld [vmem:[%s1212_s3] sm:$0xff]   ;;  %v919_v59 = vld [vmem:[%s1212_s3 + $0x18] sm:$0xff]   ;;  %v921_v61 = vld [vmem:[%s1212_s3 + $0x28] sm:$0xff]   ;;  %v954_v18 = vmov 0.0|0.0   ;;  %vm588_vm5 = vcmask 130048   ;;  %s955_s8 = smov [#allocation2]  }
  0x2d   :  { %447 = vmatpush1.bf16.msra.mxu0 %v892_v37  ;;  %593 = vmatpush1.bf16.msra.mxu1 %v916_v56  ;;  %v920_v60 = vld [vmem:[%s1212_s3 + $0x20] sm:$0xff]   ;;  %v922_v62 = vld [vmem:[%s1212_s3 + $0x30] sm:$0xff]   ;;  %v923_v14 = vld [vmem:[%s1212_s3 + $0x38] sm:$0xff]   ;;  %vm638_vm6 = vcmask 261120   ;;  %s722_s9 = sshll.u32 %s955_s8, 4  ;;  %s723_s9 = int_to_ptr.vmem [resolvable:$true] %s722_s9 }
  0x2e   :  { %448 = vmatprep.subr.bf16.mxu0 %v893_v38  ;;  %v425_v55 = vsel %vm423_vm3, %v780_v54, 0  ;;  %594 = vmatprep.subr.bf16.mxu1 %v951_v2  ;;  %v924_v15 = vld [vmem:[%s1212_s3 + $0x40] sm:$0xff]   ;;  %v635_v17 = vld [vmem:[%s1213_s4 + $0x8] sm:$0xff]  ;;  %v636_v27 = vld [vmem:[%s1213_s4 + $0x10] sm:$0xff]  ;;  %p932_p1 = scmp.lt.s32.totalorder %s723_s9, %s723_s9 }
  0x2f   :  { %v634_v16 = vld [vmem:[%s1213_s4] sm:$0xff]  ;;  %v637_v28 = vld [vmem:[%s1213_s4 + $0x18] sm:$0xff]  ;;  %s927_s4 = scalar_lea.vmem %s723_s9, 128 }
  0x30   :  { %v835_v29 = vpack.c.bf16 %v637_v28, %v636_v27  ;;  %p928_p0 = scmp.ne.s32.totalorder %s723_s9, %s927_s4  ;;  %p933_p2 = scmp.lt.s32.totalorder %s927_s4, %s927_s4 }
  0x31   :  { %449 = vmatpush1.bf16.msra.mxu0 %v895_v39  ;;  %595 = vmatpush1.bf16.msra.mxu1 %v917_v57 }
  0x32   :  { %450 = vmatprep.subr.bf16.mxu0 %v896_v40  ;;  %596 = vmatprep.subr.bf16.mxu1 %v951_v2  ;;  %p934_p3 = por %p933_p2, %p932_p1 }
  0x34   :  { %p935_p4 = pnand %p934_p3, %p928_p0 }
  0x35   :  { %451 = vmatpush1.bf16.msra.mxu0 %v898_v41  ;;  %597 = vmatpush1.bf16.msra.mxu1 %v918_v58 }
  0x36   :  { %452 = vmatprep.subr.bf16.mxu0 %v899_v42  ;;  %598 = vmatprep.subr.bf16.mxu1 %v951_v2 }
  0x39   :  { %453 = vmatpush1.bf16.msra.mxu0 %v901_v43  ;;  %599 = vmatpush1.bf16.msra.mxu1 %v919_v59 }
  0x3a   :  { %454 = vmatprep.subr.bf16.mxu0 %v902_v44  ;;  %600 = vmatprep.subr.bf16.mxu1 %v951_v2 }
  0x3d   :  { %455 = vmatpush1.bf16.msra.mxu0 %v904_v45  ;;  %601 = vmatpush1.bf16.msra.mxu1 %v920_v60 }
  0x3e   :  { %456 = vmatprep.subr.bf16.mxu0 %v905_v46  ;;  %602 = vmatprep.subr.bf16.mxu1 %v951_v2 }
  0x41   :  { %457 = vmatpush1.bf16.msra.mxu0 %v907_v47  ;;  %603 = vmatpush1.bf16.msra.mxu1 %v921_v61 }
  0x42   :  { %458 = vmatprep.subr.bf16.mxu0 %v908_v48  ;;  %604 = vmatprep.subr.bf16.mxu1 %v951_v2 }
  0x45   :  { %459 = vmatpush1.bf16.msra.mxu0 %v910_v49  ;;  %605 = vmatpush1.bf16.msra.mxu1 %v922_v62 }
  0x46   :  { %460 = vmatprep.subr.bf16.mxu0 %v911_v50  ;;  %606 = vmatprep.subr.bf16.mxu1 %v951_v2 }
  0x49   :  { %461 = vmatpush1.bf16.msra.mxu0 %v913_v51  ;;  %607 = vmatpush1.bf16.msra.mxu1 %v923_v14 }
  0x4a   :  { %782 = vmatprep.subr.msk.bf16.mxu0 %vm423_vm3, %v781_v53  ;;  %608 = vmatprep.subr.bf16.mxu1 %v951_v2 }
  0x4d   :  { %609 = vmatpush1.bf16.msra.mxu1 %v924_v15 }
  0xe9   :  { %v168_v63 = vpop.f32.mrb[0].mxu1 }
  0xea   :  { %v215_v0 = vmax.f32 %v168_v63, 0.0  ;;  %v170_v1 = vpop.f32.mrb[1].mxu1 }
  0xeb   :  { %v172_v3 = vpop.f32.mrb[2].mxu1  ;;  %v216_v4 = vmax.f32 %v170_v1, 0.0 }
  0xec   :  { %v218_v5 = vpack.c.bf16 %v215_v0, %v215_v0  ;;  %v173_v6 = vpop.f32.mrb[3].mxu1 }
  0xed   :  { %v219_v7 = vpack.c.bf16 %v216_v4, %v216_v4 }
  0xef   :  { %462 = vmatprep.mubr.bf16.mxu0 %v219_v7 }
  0xf0   :  { %463 = vmatmul.mubr.bf16.vlgmr.msra.gmra.mrb[0].mxu0 %v218_v5 }
  0xf1   :  { %472 = vmatpush1.bf16.msra.mxu0 %v425_v55  ;;  %503 = vmatprep.mubr.bf16.mxu0 %v951_v2 }
  0xf2   :  { %831 = vmatprep.subr.bf16.mxu0 %v954_v18 }
  0xfd   :  { %v209_v8 = vpop.f32.mrb[4].mxu1 }
  0xfe   :  { %v217_v9 = vmax.f32 %v209_v8, 0.0  ;;  %v818_v10 = vpop.f32.mrb[5].mxu1 }
  0xff   :  { %v212_v11 = vpop.f32.mrb[6].mxu1 }
 0x100   :  { %v220_v12 = vpack.c.bf16 %v217_v9, %v217_v9  ;;  %v819_v13 = vpop.f32.mrb[7].mxu1 }
 0x102   :  { %783 = vmatmul.mubr.msk.bf16.vlgmr.msra.gmra.mrb[0].mxu0 %vm419_vm4, %v220_v12 }
 0x103   :  { %828 = vmatprep.mubr.msk.f32.mxu0 %vm953_vm2, %v952_v19  ;;  %v832_v19 = vpack.c.bf16 %v635_v17, %v634_v16 }
 0x105   :  { %833 = vmatpush3.bf16.msra.mxu0 %v832_v19 }
 0x106   :  { %834 = vmatprep.subr.bf16.mxu0 %v954_v18 }
 0x109   :  { %836 = vmatpush3.bf16.msra.mxu0 %v835_v29 }
 0x1d5   :  { %v505_v20 = vpop.f32.mrb[0].mxu0 }
 0x1d6   :  { %v512_v2 = vmax.f32 %v505_v20, 0.0  ;;  %v507_v21 = vpop.f32.mrb[1].mxu0 }
 0x1d7   :  { %v513_v22 = vmax.f32 %v507_v21, 0.0  ;;  %v509_v23 = vpop.f32.mrb[2].mxu0 }
 0x1d8   :  { %v510_v24 = vpop.f32.mrb[3].mxu0  ;;  %v514_v26 = vpack.c.bf16 %v512_v2, %v512_v2 }
 0x1d9   :  { %v515_v25 = vpack.c.bf16 %v513_v22, %v513_v22 }
 0x1db   :  { %793 = vmatprep.mubr.msk.bf16.mxu1 %vm588_vm5, %v515_v25 }
 0x1dc   :  { %625 = vmatmul.mubr.bf16.vlgmr.msra.gmra.mrb[8].mxu1 %v514_v26 }
 0x2af   :  { %v626_v30 = vpop.f32.mrb[8].mxu1 }
 0x2b0   :  { %v632_v31 = vmax.f32 %v626_v30, 0.0  ;;  %v628_v32 = vpop.f32.mrb[9].mxu1 }
 0x2b1   :  { %v629_v33 = vpop.f32.mrb[10].mxu1 }
 0x2b2   :  { %v633_v34 = vmin.f32 %v632_v31, 1.0  ;;  %v630_v35 = vpop.f32.mrb[11].mxu1 }
 0x2b4   :  { %829 = vmatmul.mubr.msk.f32.vlgmr.msra.gmra.mrb[4].mxu0 %vm638_vm6, %v633_v34 }
 0x387   :  { %v708_v36 = vpop.f32.mrb[4].mxu0 }
 0x388   :  { %v712_v37 = vmax.f32 %v708_v36, 1e-12  ;;  %v830_v38 = vpop.f32.mrb[5].mxu0 }
 0x38a   :  { %925 = vrcp.f32 %v712_v37 }
 0x394   :  { %v926_v39 = vpop.eup %925 }
 0x395   :  { %v714_v40 = vmul.f32 %v926_v39, %v633_v34 }
 0x397   :  { %715 = vst.msk [vmem:[#allocation2] sm:$0xff] %vm638_vm6, %v714_v40 }
 0x398   :  { %938 = shalt.err (!%p935_p4)
}
 0x399   :  { %s939_s12 = scalar_lea.hbm %s1214_s5, 128 }
 0x39a   :  { %p940_p5 = scmp.ne.s32.totalorder %s1214_s5, %s939_s12  ;;  %p943_p6 = scmp.lt.u32.totalorder %s939_s12, %s1214_s5 }
 0x39c   :  { %p945_p7 = pnand %p943_p6, %p940_p5 }
 0x39e   :  { %948 = shalt.err (!%p945_p7)
}
 0x39f   :  { %725 = dma.vmem_to_hbm [thread:$0]  %s723_s9, 128, %s1214_s5, [#allocation3]  }
 0x3a0   :  { %949 = dma.done.wait [#allocation3], 128  }
 0x3a1   :  { %950 = vsyncadd [#allocation3], 4294967168 }
 0x3a2   :  { %729 = vsyncpa [#allocation3], 1 }

</bundles_post_ra>
